<compile_context>
chip_gen: v7x
topology: tpu7x:2x2x1
jax: 0.10.0
libtpu: 0.0.40
codegen_flags: <defaults>
</compile_context>

<pallas_src>
import functools

import jax
import jax.numpy as jnp
from jax.experimental import pallas as pl


# ---------------- fused Pallas kernel ----------------

def _make_fused_kernel(B, B_pad, N, Fin, num_layers, P):
    """Fused kernel: all GCN layers for all B graphs + node-max readout +
    final Linear, in ONE grid step.  Weights/biases arrive stacked."""

    def kernel(a_ref, x_ref, m_ref, w_ref, b_ref, o_ref):
        # a_ref : (B, N, N)        adjacency per graph
        # x_ref : (B, N, Fin)      raw node features
        # m_ref : (B, N, 1)        node validity mask
        # w_ref : (L+1, P, P)      stacked, zero-padded weights (last = fc)
        # b_ref : (L+1, 8, P)      stacked, zero-padded biases  (row 0 = bias)
        # o_ref : (B_pad, P)       padded graph-level output
        pooled = []
        for g in range(B):                      # static loop over graphs
            a = a_ref[g]                                        # (N, N)
            h = x_ref[g]                                        # (N, Fin)
            # Hoist the lane-broadcast of the mask out of the layer loop.
            m = jnp.broadcast_to(m_ref[g], (N, P))              # (N, P)

            for l in range(num_layers):
                # message passing: sum of in-neighbor features == A @ h
                h = jnp.dot(a, h, preferred_element_type=jnp.float32)
                w = w_ref[l]                                    # (P, P)
                if l == 0:
                    w = w[0:Fin, :]                             # (Fin, P)
                b = b_ref[l][0:1, :]                            # (1, P)
                # linear + node mask (no activation, matching the reference)
                h = (jnp.dot(h, w, preferred_element_type=jnp.float32) + b) * m

            # Graph-level max pooling over ALL N rows (masked rows are zero,
            # exactly like the reference which also zeroes then maxes).
            pooled.append(jnp.max(h, axis=0, keepdims=True))    # (1, P)

        if B_pad > B:
            pooled.append(jnp.zeros((B_pad - B, P), jnp.float32))
        gvec = jnp.concatenate(pooled, axis=0)                  # (B_pad, P)

        # Readout fc for all graphs at once; single unmasked (8, P) store.
        wf = w_ref[num_layers]                                  # (P, P)
        bf = b_ref[num_layers][0:1, :]                          # (1, P)
        o_ref[...] = jnp.dot(gvec, wf, preferred_element_type=jnp.float32) + bf

    return kernel


# ---------------- one-time parameter preparation (init-time, not per-call) ----------------

def prepare_gcn_params(layer_params, fc_w, fc_b):
    """Pad and stack all linear parameters once.

    layer_params: list of (w (Fin, Fout), b (Fout,)-like) per GCN layer.
    fc_w: (F_last, out_dim), fc_b: (out_dim,)-like.
    Returns (w_stack (L+1, P, P), b_stack (L+1, 8, P)).
    """
    L = len(layer_params)
    dims = [layer_params[0][0].shape[0]] + [w.shape[1] for (w, _) in layer_params] \
           + [fc_w.shape[1]]
    P = 128 * pl.cdiv(max(dims), 128)

    w_stack = jnp.zeros((L + 1, P, P), jnp.float32)
    b_stack = jnp.zeros((L + 1, 8, P), jnp.float32)
    for l, (w, b) in enumerate(layer_params):
        w_stack = w_stack.at[l, : w.shape[0], : w.shape[1]].set(w.astype(jnp.float32))
        b_stack = b_stack.at[l, 0, : b.size].set(b.reshape(-1).astype(jnp.float32))
    w_stack = w_stack.at[L, : fc_w.shape[0], : fc_w.shape[1]].set(fc_w.astype(jnp.float32))
    b_stack = b_stack.at[L, 0, : fc_b.size].set(fc_b.reshape(-1).astype(jnp.float32))
    return w_stack, b_stack


# ---------------- per-call forward wrapper ----------------

@functools.partial(jax.jit, static_argnames=("out_dim",))
def gcn_forward(adj, x, mask, w_stack, b_stack, *, out_dim):
    """Fused GCN forward.

    adj:  (B, N, N) f32 adjacency per graph.
    x:    (B, N, Fin) node features.
    mask: (B, N, 1) node validity mask.
    w_stack: (L+1, P, P) stacked padded weights (from prepare_gcn_params).
    b_stack: (L+1, 8, P) stacked padded biases.
    Returns (B, out_dim).
    """
    B, N, Fin = x.shape
    Lp1, P, _ = w_stack.shape
    num_layers = Lp1 - 1
    B_pad = 8 * pl.cdiv(B, 8)       # pad batch rows to a full sublane tile

    kernel = _make_fused_kernel(B, B_pad, N, Fin, num_layers, P)

    out_p = pl.pallas_call(
        kernel,
        out_shape=jax.ShapeDtypeStruct((B_pad, P), jnp.float32),
        grid=(1,),
        in_specs=[
            pl.BlockSpec((B, N, N), lambda i: (0, 0, 0)),     # adjacency
            pl.BlockSpec((B, N, Fin), lambda i: (0, 0, 0)),   # node features
            pl.BlockSpec((B, N, 1), lambda i: (0, 0, 0)),     # node mask
            pl.BlockSpec((Lp1, P, P), lambda i: (0, 0, 0)),   # stacked weights
            pl.BlockSpec((Lp1, 8, P), lambda i: (0, 0, 0)),   # stacked biases
        ],
        out_specs=pl.BlockSpec((B_pad, P), lambda i: (0, 0)),
    )(adj.astype(jnp.float32), x.astype(jnp.float32), mask.astype(jnp.float32),
      w_stack, b_stack)

    return out_p[:B, :out_dim]


# ---------------- driver ----------------

if __name__ == "__main__":
    B, N = 2, 16
    in_dim, out_dim = 8, 4
    hidden_dim = [64, 32]

    key = jax.random.PRNGKey(0)
    keys = jax.random.split(key, 16)

    # data[0]: node features (B, N, F)
    x = jax.random.normal(keys[0], (B, N, in_dim), dtype=jnp.float32)
    # data[1]: binary adjacency per graph
    adj = (jax.random.uniform(keys[1], (B, N, N)) < 0.3).astype(jnp.float32)
    # data[2]: node mask — second graph has 4 padded nodes
    n_valid = jnp.array([N, N - 4])
    mask = (jnp.arange(N)[None, :] < n_valid[:, None]).astype(jnp.float32)[..., None]  # (B, N, 1)

    # deterministic parameter init (PyTorch Linear default: U(-1/sqrt(fan_in), 1/sqrt(fan_in)))
    dims = [in_dim] + hidden_dim
    layer_params = []
    kidx = 2
    for fin, fout in zip(dims[:-1], dims[1:]):
        k = float(1.0 / (fin ** 0.5))
        w = jax.random.uniform(keys[kidx], (fin, fout), minval=-k, maxval=k, dtype=jnp.float32)
        kidx += 1
        b = jax.random.uniform(keys[kidx], (1, fout), minval=-k, maxval=k, dtype=jnp.float32)
        kidx += 1
        layer_params.append((w, b))
    k = float(1.0 / (hidden_dim[-1] ** 0.5))
    fc_w = jax.random.uniform(keys[kidx], (hidden_dim[-1], out_dim),
                              minval=-k, maxval=k, dtype=jnp.float32)
    fc_b = jax.random.uniform(keys[kidx + 1], (1, out_dim),
                              minval=-k, maxval=k, dtype=jnp.float32)

    # one-time (init) parameter padding/stacking — NOT in the per-call path
    w_stack, b_stack = prepare_gcn_params(layer_params, fc_w, fc_b)
    w_stack, b_stack = jax.block_until_ready((w_stack, b_stack))

    out = gcn_forward(adj, x, mask, w_stack, b_stack, out_dim=out_dim)
    out = jax.block_until_ready(out)

    # pure-JAX reference for sanity
    hr = x
    for (w, b) in layer_params:
        hr = (jnp.einsum('bij,bjf->bif', adj, hr) @ w + b) * mask
    ref = jnp.max(hr, axis=1) @ fc_w + fc_b
    assert out.shape == (B, out_dim)
    assert jnp.allclose(out, ref, atol=1e-4, rtol=1e-4), "mismatch vs reference"

    print("KERNEL_OK")
</pallas_src>

<mosaic_0001>
module attributes {stable_mosaic.version = 11 : i64} {
  func.func @kernel(%arg0: i32, %arg1: memref<2x16x16xf32, #tpu.memory_space<vmem>>, %arg2: memref<2x16x8xf32, #tpu.memory_space<vmem>>, %arg3: memref<2x16x1xf32, #tpu.memory_space<vmem>>, %arg4: memref<3x128x128xf32, #tpu.memory_space<vmem>>, %arg5: memref<3x8x128xf32, #tpu.memory_space<vmem>>, %arg6: memref<8x128xf32, #tpu.memory_space<vmem>>) attributes {dimension_semantics = [#tpu.dimension_semantics<arbitrary>], iteration_bounds = array<i64: 1>, scalar_prefetch = 0 : i64, scratch_operands = 0 : i64, tpu.core_type = #tpu.core_type<tc>, window_params = [{pipeline_mode = #tpu.pipeline_mode<synchronous>, transform_indices = @transform_0, window_bounds = array<i64: 2, 16, 16>}, {pipeline_mode = #tpu.pipeline_mode<synchronous>, transform_indices = @transform_1, window_bounds = array<i64: 2, 16, 8>}, {pipeline_mode = #tpu.pipeline_mode<synchronous>, transform_indices = @transform_2, window_bounds = array<i64: 2, 16, 1>}, {pipeline_mode = #tpu.pipeline_mode<synchronous>, transform_indices = @transform_3, window_bounds = array<i64: 3, 128, 128>}, {pipeline_mode = #tpu.pipeline_mode<synchronous>, transform_indices = @transform_4, window_bounds = array<i64: 3, 8, 128>}, {pipeline_mode = #tpu.pipeline_mode<synchronous>, transform_indices = @transform_5, window_bounds = array<i64: 8, 128>}]} {
    %c0 = arith.constant 0 : index
    %c0_0 = arith.constant 0 : index
    %c0_1 = arith.constant 0 : index
    %0 = vector.load %arg1[%c0, %c0_0, %c0_1] : memref<2x16x16xf32, #tpu.memory_space<vmem>>, vector<1x16x16xf32>
    %1 = vector.shape_cast %0 : vector<1x16x16xf32> to vector<16x16xf32>
    %c0_2 = arith.constant 0 : index
    %c0_3 = arith.constant 0 : index
    %c0_4 = arith.constant 0 : index
    %2 = vector.load %arg2[%c0_2, %c0_3, %c0_4] : memref<2x16x8xf32, #tpu.memory_space<vmem>>, vector<1x16x8xf32>
    %3 = vector.shape_cast %2 : vector<1x16x8xf32> to vector<16x8xf32>
    %c0_5 = arith.constant 0 : index
    %c0_6 = arith.constant 0 : index
    %c0_7 = arith.constant 0 : index
    %4 = vector.load %arg3[%c0_5, %c0_6, %c0_7] : memref<2x16x1xf32, #tpu.memory_space<vmem>>, vector<1x16x1xf32>
    %5 = vector.shape_cast %4 : vector<1x16x1xf32> to vector<16x1xf32>
    %6 = vector.shape_cast %5 : vector<16x1xf32> to vector<16x1xf32>
    %7 = vector.broadcast %6 : vector<16x1xf32> to vector<16x128xf32>
    %cst = arith.constant dense<0.000000e+00> : vector<16x8xf32>
    %8 = tpu.matmul %1, %3, %cst {dimension_numbers = #tpu.dot_dimension_numbers<[1], [0], [0], [1], [0, 0, 1, 1], [], []>} : vector<16x16xf32>, vector<16x8xf32>, vector<16x8xf32> -> vector<16x8xf32>
    %c0_8 = arith.constant 0 : index
    %c0_9 = arith.constant 0 : index
    %c0_10 = arith.constant 0 : index
    %9 = vector.load %arg4[%c0_8, %c0_9, %c0_10] : memref<3x128x128xf32, #tpu.memory_space<vmem>>, vector<1x128x128xf32>
    %10 = vector.shape_cast %9 : vector<1x128x128xf32> to vector<128x128xf32>
    %11 = vector.extract_strided_slice %10 {offsets = [0, 0], sizes = [8, 128], strides = [1, 1]} : vector<128x128xf32> to vector<8x128xf32>
    %c0_11 = arith.constant 0 : index
    %c0_12 = arith.constant 0 : index
    %c0_13 = arith.constant 0 : index
    %12 = vector.load %arg5[%c0_11, %c0_12, %c0_13] : memref<3x8x128xf32, #tpu.memory_space<vmem>>, vector<1x8x128xf32>
    %13 = vector.shape_cast %12 : vector<1x8x128xf32> to vector<8x128xf32>
    %14 = vector.extract_strided_slice %13 {offsets = [0, 0], sizes = [1, 128], strides = [1, 1]} : vector<8x128xf32> to vector<1x128xf32>
    %cst_14 = arith.constant dense<0.000000e+00> : vector<16x128xf32>
    %15 = tpu.matmul %8, %11, %cst_14 {dimension_numbers = #tpu.dot_dimension_numbers<[1], [0], [0], [1], [0, 0, 1, 1], [], []>} : vector<16x8xf32>, vector<8x128xf32>, vector<16x128xf32> -> vector<16x128xf32>
    %16 = vector.broadcast %14 : vector<1x128xf32> to vector<16x128xf32>
    %17 = arith.addf %15, %16 : vector<16x128xf32>
    %18 = arith.mulf %17, %7 : vector<16x128xf32>
    %cst_15 = arith.constant dense<0.000000e+00> : vector<16x128xf32>
    %19 = tpu.matmul %1, %18, %cst_15 {dimension_numbers = #tpu.dot_dimension_numbers<[1], [0], [0], [1], [0, 0, 1, 1], [], []>} : vector<16x16xf32>, vector<16x128xf32>, vector<16x128xf32> -> vector<16x128xf32>
    %c1 = arith.constant 1 : index
    %c0_16 = arith.constant 0 : index
    %c0_17 = arith.constant 0 : index
    %20 = vector.load %arg4[%c1, %c0_16, %c0_17] : memref<3x128x128xf32, #tpu.memory_space<vmem>>, vector<1x128x128xf32>
    %21 = vector.shape_cast %20 : vector<1x128x128xf32> to vector<128x128xf32>
    %c1_18 = arith.constant 1 : index
    %c0_19 = arith.constant 0 : index
    %c0_20 = arith.constant 0 : index
    %22 = vector.load %arg5[%c1_18, %c0_19, %c0_20] : memref<3x8x128xf32, #tpu.memory_space<vmem>>, vector<1x8x128xf32>
    %23 = vector.shape_cast %22 : vector<1x8x128xf32> to vector<8x128xf32>
    %24 = vector.extract_strided_slice %23 {offsets = [0, 0], sizes = [1, 128], strides = [1, 1]} : vector<8x128xf32> to vector<1x128xf32>
    %cst_21 = arith.constant dense<0.000000e+00> : vector<16x128xf32>
    %25 = tpu.matmul %19, %21, %cst_21 {dimension_numbers = #tpu.dot_dimension_numbers<[1], [0], [0], [1], [0, 0, 1, 1], [], []>} : vector<16x128xf32>, vector<128x128xf32>, vector<16x128xf32> -> vector<16x128xf32>
    %26 = vector.broadcast %24 : vector<1x128xf32> to vector<16x128xf32>
    %27 = arith.addf %25, %26 : vector<16x128xf32>
    %28 = arith.mulf %27, %7 : vector<16x128xf32>
    %cst_22 = arith.constant dense<0xFF800000> : vector<128xf32>
    %29 = vector.multi_reduction <maximumf>, %28, %cst_22 [0] : vector<16x128xf32> to vector<128xf32>
    %30 = vector.shape_cast %29 : vector<128xf32> to vector<1x128xf32>
    %c1_23 = arith.constant 1 : index
    %c0_24 = arith.constant 0 : index
    %c0_25 = arith.constant 0 : index
    %31 = vector.load %arg1[%c1_23, %c0_24, %c0_25] : memref<2x16x16xf32, #tpu.memory_space<vmem>>, vector<1x16x16xf32>
    %32 = vector.shape_cast %31 : vector<1x16x16xf32> to vector<16x16xf32>
    %c1_26 = arith.constant 1 : index
    %c0_27 = arith.constant 0 : index
    %c0_28 = arith.constant 0 : index
    %33 = vector.load %arg2[%c1_26, %c0_27, %c0_28] : memref<2x16x8xf32, #tpu.memory_space<vmem>>, vector<1x16x8xf32>
    %34 = vector.shape_cast %33 : vector<1x16x8xf32> to vector<16x8xf32>
    %c1_29 = arith.constant 1 : index
    %c0_30 = arith.constant 0 : index
    %c0_31 = arith.constant 0 : index
    %35 = vector.load %arg3[%c1_29, %c0_30, %c0_31] : memref<2x16x1xf32, #tpu.memory_space<vmem>>, vector<1x16x1xf32>
    %36 = vector.shape_cast %35 : vector<1x16x1xf32> to vector<16x1xf32>
    %37 = vector.shape_cast %36 : vector<16x1xf32> to vector<16x1xf32>
    %38 = vector.broadcast %37 : vector<16x1xf32> to vector<16x128xf32>
    %cst_32 = arith.constant dense<0.000000e+00> : vector<16x8xf32>
    %39 = tpu.matmul %32, %34, %cst_32 {dimension_numbers = #tpu.dot_dimension_numbers<[1], [0], [0], [1], [0, 0, 1, 1], [], []>} : vector<16x16xf32>, vector<16x8xf32>, vector<16x8xf32> -> vector<16x8xf32>
    %c0_33 = arith.constant 0 : index
    %c0_34 = arith.constant 0 : index
    %c0_35 = arith.constant 0 : index
    %40 = vector.load %arg4[%c0_33, %c0_34, %c0_35] : memref<3x128x128xf32, #tpu.memory_space<vmem>>, vector<1x128x128xf32>
    %41 = vector.shape_cast %40 : vector<1x128x128xf32> to vector<128x128xf32>
    %42 = vector.extract_strided_slice %41 {offsets = [0, 0], sizes = [8, 128], strides = [1, 1]} : vector<128x128xf32> to vector<8x128xf32>
    %c0_36 = arith.constant 0 : index
    %c0_37 = arith.constant 0 : index
    %c0_38 = arith.constant 0 : index
    %43 = vector.load %arg5[%c0_36, %c0_37, %c0_38] : memref<3x8x128xf32, #tpu.memory_space<vmem>>, vector<1x8x128xf32>
    %44 = vector.shape_cast %43 : vector<1x8x128xf32> to vector<8x128xf32>
    %45 = vector.extract_strided_slice %44 {offsets = [0, 0], sizes = [1, 128], strides = [1, 1]} : vector<8x128xf32> to vector<1x128xf32>
    %cst_39 = arith.constant dense<0.000000e+00> : vector<16x128xf32>
    %46 = tpu.matmul %39, %42, %cst_39 {dimension_numbers = #tpu.dot_dimension_numbers<[1], [0], [0], [1], [0, 0, 1, 1], [], []>} : vector<16x8xf32>, vector<8x128xf32>, vector<16x128xf32> -> vector<16x128xf32>
    %47 = vector.broadcast %45 : vector<1x128xf32> to vector<16x128xf32>
    %48 = arith.addf %46, %47 : vector<16x128xf32>
    %49 = arith.mulf %48, %38 : vector<16x128xf32>
    %cst_40 = arith.constant dense<0.000000e+00> : vector<16x128xf32>
    %50 = tpu.matmul %32, %49, %cst_40 {dimension_numbers = #tpu.dot_dimension_numbers<[1], [0], [0], [1], [0, 0, 1, 1], [], []>} : vector<16x16xf32>, vector<16x128xf32>, vector<16x128xf32> -> vector<16x128xf32>
    %c1_41 = arith.constant 1 : index
    %c0_42 = arith.constant 0 : index
    %c0_43 = arith.constant 0 : index
    %51 = vector.load %arg4[%c1_41, %c0_42, %c0_43] : memref<3x128x128xf32, #tpu.memory_space<vmem>>, vector<1x128x128xf32>
    %52 = vector.shape_cast %51 : vector<1x128x128xf32> to vector<128x128xf32>
    %c1_44 = arith.constant 1 : index
    %c0_45 = arith.constant 0 : index
    %c0_46 = arith.constant 0 : index
    %53 = vector.load %arg5[%c1_44, %c0_45, %c0_46] : memref<3x8x128xf32, #tpu.memory_space<vmem>>, vector<1x8x128xf32>
    %54 = vector.shape_cast %53 : vector<1x8x128xf32> to vector<8x128xf32>
    %55 = vector.extract_strided_slice %54 {offsets = [0, 0], sizes = [1, 128], strides = [1, 1]} : vector<8x128xf32> to vector<1x128xf32>
    %cst_47 = arith.constant dense<0.000000e+00> : vector<16x128xf32>
    %56 = tpu.matmul %50, %52, %cst_47 {dimension_numbers = #tpu.dot_dimension_numbers<[1], [0], [0], [1], [0, 0, 1, 1], [], []>} : vector<16x128xf32>, vector<128x128xf32>, vector<16x128xf32> -> vector<16x128xf32>
    %57 = vector.broadcast %55 : vector<1x128xf32> to vector<16x128xf32>
    %58 = arith.addf %56, %57 : vector<16x128xf32>
    %59 = arith.mulf %58, %38 : vector<16x128xf32>
    %cst_48 = arith.constant dense<0xFF800000> : vector<128xf32>
    %60 = vector.multi_reduction <maximumf>, %59, %cst_48 [0] : vector<16x128xf32> to vector<128xf32>
    %61 = vector.shape_cast %60 : vector<128xf32> to vector<1x128xf32>
    %cst_49 = arith.constant 0.000000e+00 : f32
    %62 = vector.broadcast %cst_49 : f32 to vector<6x128xf32>
    %63 = tpu.concatenate %30, %61, %62 in 0 : vector<1x128xf32>, vector<1x128xf32>, vector<6x128xf32> -> vector<8x128xf32>
    %c2 = arith.constant 2 : index
    %c0_50 = arith.constant 0 : index
    %c0_51 = arith.constant 0 : index
    %64 = vector.load %arg4[%c2, %c0_50, %c0_51] : memref<3x128x128xf32, #tpu.memory_space<vmem>>, vector<1x128x128xf32>
    %65 = vector.shape_cast %64 : vector<1x128x128xf32> to vector<128x128xf32>
    %c2_52 = arith.constant 2 : index
    %c0_53 = arith.constant 0 : index
    %c0_54 = arith.constant 0 : index
    %66 = vector.load %arg5[%c2_52, %c0_53, %c0_54] : memref<3x8x128xf32, #tpu.memory_space<vmem>>, vector<1x8x128xf32>
    %67 = vector.shape_cast %66 : vector<1x8x128xf32> to vector<8x128xf32>
    %68 = vector.extract_strided_slice %67 {offsets = [0, 0], sizes = [1, 128], strides = [1, 1]} : vector<8x128xf32> to vector<1x128xf32>
    %cst_55 = arith.constant dense<0.000000e+00> : vector<8x128xf32>
    %69 = tpu.matmul %63, %65, %cst_55 {dimension_numbers = #tpu.dot_dimension_numbers<[1], [0], [0], [1], [0, 0, 1, 1], [], []>} : vector<8x128xf32>, vector<128x128xf32>, vector<8x128xf32> -> vector<8x128xf32>
    %70 = vector.broadcast %68 : vector<1x128xf32> to vector<8x128xf32>
    %71 = arith.addf %69, %70 : vector<8x128xf32>
    %c0_56 = arith.constant 0 : index
    %c0_57 = arith.constant 0 : index
    %72 = vector.load %arg6[%c0_56, %c0_57] : memref<8x128xf32, #tpu.memory_space<vmem>>, vector<8x128xf32>
    tpu.vector_store %arg6[%c0_56, %c0_57], %71 {strides = array<i32>} : memref<8x128xf32, #tpu.memory_space<vmem>>, vector<8x128xf32>,
    return
  }
  func.func @transform_0(%arg0: i32) -> (i32, i32, i32) {
    %c0_i32 = arith.constant 0 : i32
    %c0_i32_0 = arith.constant 0 : i32
    %c0_i32_1 = arith.constant 0 : i32
    %c0_i32_2 = arith.constant 0 : i32
    return %c0_i32, %c0_i32_0, %c0_i32_1 : i32, i32, i32
  }
  func.func @transform_1(%arg0: i32) -> (i32, i32, i32) {
    %c0_i32 = arith.constant 0 : i32
    %c0_i32_0 = arith.constant 0 : i32
    %c0_i32_1 = arith.constant 0 : i32
    %c0_i32_2 = arith.constant 0 : i32
    return %c0_i32, %c0_i32_0, %c0_i32_1 : i32, i32, i32
  }
  func.func @transform_2(%arg0: i32) -> (i32, i32, i32) {
    %c0_i32 = arith.constant 0 : i32
    %c0_i32_0 = arith.constant 0 : i32
    %c0_i32_1 = arith.constant 0 : i32
    %c0_i32_2 = arith.constant 0 : i32
    return %c0_i32, %c0_i32_0, %c0_i32_1 : i32, i32, i32
  }
  func.func @transform_3(%arg0: i32) -> (i32, i32, i32) {
    %c0_i32 = arith.constant 0 : i32
    %c0_i32_0 = arith.constant 0 : i32
    %c0_i32_1 = arith.constant 0 : i32
    %c0_i32_2 = arith.constant 0 : i32
    return %c0_i32, %c0_i32_0, %c0_i32_1 : i32, i32, i32
  }
  func.func @transform_4(%arg0: i32) -> (i32, i32, i32) {
    %c0_i32 = arith.constant 0 : i32
    %c0_i32_0 = arith.constant 0 : i32
    %c0_i32_1 = arith.constant 0 : i32
    %c0_i32_2 = arith.constant 0 : i32
    return %c0_i32, %c0_i32_0, %c0_i32_1 : i32, i32, i32
  }
  func.func @transform_5(%arg0: i32) -> (i32, i32) {
    %c0_i32 = arith.constant 0 : i32
    %c0_i32_0 = arith.constant 0 : i32
    %c0_i32_1 = arith.constant 0 : i32
    return %c0_i32, %c0_i32_0 : i32, i32
  }
}

</mosaic_0001>

<bundles_post_ra>
// kernel: gcn_forward.1
= control target key start
LH: loop header
LB: loop body
LE: loop exit
PB: predicated region body
PF: predicated region fallthrough
CT: control target
= control target key end

     0   :  { %10 = vsyncpa [#allocation3], 0  ;;  %s1225_s18 = smov [#allocation2]   ;;  %s1415_s0 = inlined_call_operand.vmem [shape: f32[2,16,16], index: 0, kind: input, shape index: {}]   ;;  %s1416_s1 = inlined_call_operand.vmem [shape: f32[2,16,8], index: 1, kind: input, shape index: {}]   ;;  %s1417_s2 = inlined_call_operand.vmem [shape: f32[2,16,1], index: 2, kind: input, shape index: {}]   ;;  %s1418_s3 = inlined_call_operand.hbm [shape: f32[3,128,128], index: 3, kind: input, shape index: {}]   ;;  %s1419_s4 = inlined_call_operand.vmem [shape: f32[3,8,128], index: 4, kind: input, shape index: {}]   ;;  %s1420_s5 = inlined_call_operand.vmem [shape: f32[8,128], index: 5, kind: output, shape index: {}]  }
   0x1   :  { %s22_s19 = sshll.u32 %s1225_s18, 4  ;;  %s1201_s22 = scalar_lea.hbm %s1418_s3, 6144  ;;  %s23_s19 = int_to_ptr.vmem [resolvable:$true] %s22_s19 }
   0x2   :  { %p1202_p0 = scmp.ne.s32.totalorder %s1418_s3, %s1201_s22  ;;  %p1205_p1 = scmp.lt.u32.totalorder %s1201_s22, %s1418_s3 }
   0x4   :  { %p1207_p2 = pnand %p1205_p1, %p1202_p0 }
   0x6   :  { %1210 = shalt.err (!%p1207_p2)
}
   0x7   :  { %s1211_s27 = scalar_lea.vmem %s23_s19, 6144  ;;  %p1216_p4 = scmp.lt.s32.totalorder %s23_s19, %s23_s19 }
   0x8   :  { %p1212_p3 = scmp.ne.s32.totalorder %s23_s19, %s1211_s27  ;;  %p1217_p5 = scmp.lt.s32.totalorder %s1211_s27, %s1211_s27 }
   0xa   :  { %p1218_p6 = por %p1217_p5, %p1216_p4 }
   0xc   :  { %p1219_p7 = pnand %p1218_p6, %p1212_p3 }
   0xe   :  { %1222 = shalt.err (!%p1219_p7)
}
   0xf   :  { %s1226_s28 = smov 128   ;;  %s1227_s29 = smov 8  }
  0x10   :  { %28 = dma.hbm_to_vmem [thread:$0]  %s1418_s3, 6144, %s23_s19, [#allocation3], %s1226_s28, %s1226_s28, %s1227_s29  }
  0x11   :  { %1223 = dma.done.wait [#allocation3], 6144  }
  0x12   :  { %1224 = vsyncadd [#allocation3], 4294961152  ;;  %vm50_vm0 = vcmask 130048   ;;  %v36_v0 = vld [vmem:[%s1416_s1] sm:$0xff]  ;;  %v37_v1 = vld [vmem:[%s1416_s1 + $0x8] sm:$0xff]  ;;  %v1228_v7 = vmov 0   ;;  %v134_v35 = vlaneseq }
  0x13   :  { %v34_v2 = vld [vmem:[%s1415_s0] sm:$0xff]  ;;  %v1088_v3 = vpack.c.bf16 %v37_v1, %v36_v0  ;;  %v1289_v5 = vld [vmem:[%s1415_s0 + $0x8] sm:$0xff]  ;;  %1199 = vset.pattern.permute.xlu0 %v1228_v7  ;;  %1200 = vset.pattern.permute.xlu1 %v1228_v7  ;;  %vm138_vm1 = vcmask 64512   ;;  %v300_v13 = vld [vmem:[#allocation2 + $0x90] sm:$0xff]  ;;  %vm1230_vm2 = vmmov 0   ;;  %vm746_vm3 = vcmask 1040384  }
  0x14   :  { %949 = vmatprep.mubr.msk.f32.mxu1 %vm50_vm0, %v34_v2  ;;  %v1284_v4 = vld [vmem:[#allocation2] sm:$0xff]  ;;  %v39_v8 = vld [vmem:[%s1417_s2 + $0x8] sm:$0xff]  ;;  %v301_v15 = vld [vmem:[#allocation2 + $0x98] sm:$0xff]  ;;  %v135_v36 = vshrl.u32 %v134_v35, 7  ;;  %vm748_vm4 = vcmask 1041408  }
  0x15   :  { %1089 = vmatprep.subr.bf16.mxu1 %v1088_v3  ;;  %v38_v6 = vld [vmem:[%s1417_s2] sm:$0xff]  ;;  %v299_v12 = vld [vmem:[#allocation2 + $0x88] sm:$0xff]  ;;  %v1306_v16 = vpack.c.bf16 %v301_v15, %v300_v13  ;;  %v304_v20 = vld [vmem:[#allocation2 + $0xb0] sm:$0xff] }
  0x16   :  { %1091 = vmatpush3.bf16.msra.mxu1 %v1088_v3  ;;  %42 = vperm.xlu0 %1199, %v38_v6   ;;  %v298_v11 = vld [vmem:[#allocation2 + $0x80] sm:$0xff]  ;;  %v303_v18 = vld [vmem:[#allocation2 + $0xa8] sm:$0xff]  ;;  %v305_v21 = vld [vmem:[#allocation2 + $0xb8] sm:$0xff]  ;;  %v1336_v37 = vsub.s32 0, %v135_v36 }
  0x17   :  { %952 = vmatprep.subr.mxu1 %v1284_v4  ;;  %v1304_v14 = vpack.c.bf16 %v299_v12, %v298_v11  ;;  %v302_v17 = vld [vmem:[#allocation2 + $0xa0] sm:$0xff]  ;;  %v1315_v22 = vpack.c.bf16 %v305_v21, %v304_v20  ;;  %v307_v24 = vld [vmem:[#allocation2 + $0xc8] sm:$0xff]  ;;  %v308_v26 = vld [vmem:[#allocation2 + $0xd0] sm:$0xff] }
  0x18   :  { %v1311_v19 = vpack.c.bf16 %v303_v18, %v302_v17  ;;  %v306_v23 = vld [vmem:[#allocation2 + $0xc0] sm:$0xff]  ;;  %v309_v27 = vld [vmem:[#allocation2 + $0xd8] sm:$0xff]  ;;  %v311_v30 = vld [vmem:[#allocation2 + $0xe8] sm:$0xff]  ;;  %v1229_v17 = vmov 0.0|0.0  }
  0x19   :  { %950 = vmatmul.mubr.msk.f32.vlgmr.msra.gmra.mrb[0].mxu1 %vm50_vm0, %v1289_v5  ;;  %1097 = vmatprep.subr.bf16.mxu0 %v1304_v14  ;;  %v1319_v25 = vpack.c.bf16 %v307_v24, %v306_v23  ;;  %v1323_v28 = vpack.c.bf16 %v309_v27, %v308_v26  ;;  %v310_v29 = vld [vmem:[#allocation2 + $0xe0] sm:$0xff]  ;;  %v312_v32 = vld [vmem:[#allocation2 + $0xf0] sm:$0xff]  ;;  %v313_v33 = vld [vmem:[#allocation2 + $0xf8] sm:$0xff] }
  0x1a   :  { %953 = vmatpush3.msra.mxu1 %v1284_v4  ;;  %47 = vperm.xlu0 %1199, %v39_v8   ;;  %v1327_v31 = vpack.c.bf16 %v311_v30, %v310_v29  ;;  %v1331_v34 = vpack.c.bf16 %v313_v33, %v312_v32  ;;  %v133_v38 = vld [vmem:[%s1419_s4] sm:$0xff]  ;;  %v858_v47 = vld [vmem:[%s1416_s1 + $0x10] sm:$0xff]  ;;  %v859_v48 = vld [vmem:[%s1416_s1 + $0x18] sm:$0xff] }
  0x1b   :  { %1099 = vmatpush3.bf16.msra.mxu0 %v1304_v14  ;;  %v137_v40 = vrot.slane %v133_v38, %v1336_v37  ;;  %v1128_v51 = vpack.c.bf16 %v859_v48, %v858_v47  ;;  %v856_v52 = vld [vmem:[%s1415_s0 + $0x10] sm:$0xff]  ;;  %v857_v53 = vld [vmem:[%s1415_s0 + $0x18] sm:$0xff]  ;;  %v855_v60 = vld [vmem:[%s1419_s4 + $0x8] sm:$0xff] }
  0x1c   :  { %1101 = vmatprep.subr.bf16.mxu0 %v1306_v16  ;;  %v860_v54 = vld [vmem:[%s1417_s2 + $0x10] sm:$0xff]  ;;  %v861_v55 = vld [vmem:[%s1417_s2 + $0x18] sm:$0xff]  ;;  %v1373_v61 = vrot.slane %v855_v60, %v1336_v37  ;;  %v752_v15 = vld [vmem:[#allocation2 + $0x108] sm:$0xff] }
  0x1d   :  { %415 = vperm.xlu1 %1200, %v860_v54   ;;  %v755_v21 = vld [vmem:[#allocation2 + $0x120] sm:$0xff]  ;;  %v757_v26 = vld [vmem:[#allocation2 + $0x130] sm:$0xff]  ;;  %v758_v27 = vld [vmem:[#allocation2 + $0x138] sm:$0xff] }
  0x1e   :  { %v759_v29 = vld [vmem:[#allocation2 + $0x140] sm:$0xff]  ;;  %v760_v30 = vld [vmem:[#allocation2 + $0x148] sm:$0xff]  ;;  %v761_v32 = vld [vmem:[#allocation2 + $0x150] sm:$0xff] }
  0x1f   :  { %1103 = vmatpush3.bf16.msra.mxu0 %v1306_v16  ;;  %v762_v33 = vld [vmem:[#allocation2 + $0x158] sm:$0xff]  ;;  %v763_v35 = vld [vmem:[#allocation2 + $0x160] sm:$0xff]  ;;  %v764_v36 = vld [vmem:[#allocation2 + $0x168] sm:$0xff] }
  0x20   :  { %1105 = vmatprep.subr.bf16.mxu0 %v1311_v19  ;;  %v1187_v38 = vpack.c.bf16 %v764_v36, %v763_v35 }
  0x21   :  { %420 = vperm.xlu1 %1200, %v861_v55  }
  0x23   :  { %1107 = vmatpush3.bf16.msra.mxu0 %v1311_v19 }
  0x24   :  { %1109 = vmatprep.subr.bf16.mxu0 %v1315_v22 }
  0x27   :  { %1111 = vmatpush3.bf16.msra.mxu0 %v1315_v22 }
  0x28   :  { %1113 = vmatprep.subr.bf16.mxu0 %v1319_v25 }
  0x2b   :  { %1115 = vmatpush3.bf16.msra.mxu0 %v1319_v25 }
  0x2c   :  { %1117 = vmatprep.subr.bf16.mxu0 %v1323_v28 }
  0x2f   :  { %1119 = vmatpush3.bf16.msra.mxu0 %v1323_v28 }
  0x30   :  { %1121 = vmatprep.subr.bf16.mxu0 %v1327_v31 }
  0x33   :  { %1123 = vmatpush3.bf16.msra.mxu0 %v1327_v31 }
  0x34   :  { %1125 = vmatprep.subr.bf16.mxu0 %v1331_v34 }
  0x37   :  { %1127 = vmatpush3.bf16.msra.mxu0 %v1331_v34 }
  0x38   :  { %1168 = vmatprep.subr.bf16.mxu0 %v1229_v17 }
  0x95   :  { %v43_v39 = vpop.permute.xlu0 %42 }
  0x99   :  { %v48_v44 = vpop.permute.xlu0 %47 }
  0x9c   :  { %v1375_v62 = vpop.permute.xlu1 %415 }
  0xec   :  { %v951_v9 = vpop.f32.mrb[0].mxu1 }
  0xed   :  { %v123_v10 = vpop.f32.mrb[1].mxu1 }
  0xee   :  { %954 = vmatprep.mubr.msk.f32.mxu1 %vm138_vm1, %v123_v10 }
  0xef   :  { %955 = vmatmul.mubr.msk.f32.vlgmr.msra.gmra.mrb[2].mxu1 %vm138_vm1, %v951_v9  ;;  %v1381_v9 = vpop.permute.xlu1 %420 }
  0xf0   :  { %961 = vmatprep.mubr.msk.f32.mxu1 %vm50_vm0, %v34_v2 }
 0x1c2   :  { %v956_v41 = vpop.f32.mrb[2].mxu1 }
 0x1c3   :  { %v217_v42 = vadd.f32 %v956_v41, %v137_v40  ;;  %v211_v43 = vpop.f32.mrb[3].mxu1 }
 0x1c4   :  { %v212_v45 = vadd.f32 %v211_v43, %v137_v40 }
 0x1c5   :  { %v221_v46 = vmul.f32 %v217_v42, %v48_v44  ;;  %v1231_v42 = vmov 0.0  }
 0x1c6   :  { %v220_v49 = vmul.f32 %v212_v45, %v43_v39 }
 0x1c8   :  { %v1092_v50 = vpack.c.bf16 %v221_v46, %v220_v49 }
 0x1ca   :  { %1093 = vmatprep.subr.bf16.mxu1 %v1092_v50 }
 0x1cb   :  { %1095 = vmatpush3.bf16.msra.mxu1 %v1092_v50 }
 0x1cc   :  { %1129 = vmatprep.subr.bf16.mxu1 %v1128_v51 }
 0x1ce   :  { %962 = vmatmul.mubr.msk.f32.vlgmr.msra.gmra.mrb[4].mxu1 %vm50_vm0, %v1289_v5 }
 0x1cf   :  { %1131 = vmatpush3.bf16.msra.mxu1 %v1128_v51  ;;  %1003 = vmatprep.mubr.msk.f32.mxu1 %vm50_vm0, %v856_v52 }
 0x1d0   :  { %1006 = vmatprep.subr.mxu1 %v1284_v4 }
 0x1d2   :  { %1004 = vmatmul.mubr.msk.f32.vlgmr.msra.gmra.mrb[6].mxu1 %vm50_vm0, %v857_v53 }
 0x1d3   :  { %1007 = vmatpush3.msra.mxu1 %v1284_v4 }
 0x2a1   :  { %v963_v56 = vpop.f32.mrb[4].mxu1 }
 0x2a2   :  { %v288_v57 = vpop.f32.mrb[5].mxu1 }
 0x2a3   :  { %996 = vmatprep.mubr.f32.mxu0 %v288_v57 }
 0x2a4   :  { %997 = vmatmul.mubr.f32.vlgmr.msra.gmra.mrb[0].mxu0 %v963_v56 }
 0x2a5   :  { %v1005_v58 = vpop.f32.mrb[6].mxu1  ;;  %1085 = vmatprep.mubr.msk.f32.mxu0 %vm1230_vm2, %v1231_v42 }
 0x2a6   :  { %v495_v59 = vpop.f32.mrb[7].mxu1 }
 0x2a7   :  { %1008 = vmatprep.mubr.msk.f32.mxu1 %vm138_vm1, %v495_v59 }
 0x2a8   :  { %1009 = vmatmul.mubr.msk.f32.vlgmr.msra.gmra.mrb[8].mxu1 %vm138_vm1, %v1005_v58 }
 0x2a9   :  { %1015 = vmatprep.mubr.msk.f32.mxu1 %vm50_vm0, %v856_v52 }
 0x377   :  { %v998_v63 = vpop.f32.mrb[0].mxu0 }
 0x378   :  { %v392_v0 = vadd.f32 %v998_v63, %v1373_v61  ;;  %v386_v1 = vpop.f32.mrb[1].mxu0 }
 0x379   :  { %v387_v2 = vadd.f32 %v386_v1, %v1373_v61 }
 0x37a   :  { %v396_v3 = vmul.f32 %v392_v0, %v48_v44 }
 0x37b   :  { %v395_v4 = vmul.f32 %v387_v2, %v43_v39  ;;  %v1010_v5 = vpop.f32.mrb[8].mxu1  ;;  %v765_v39 = vld [vmem:[#allocation2 + $0x170] sm:$0xff] }
 0x37c   :  { %v582_v6 = vadd.f32 %v1010_v5, %v137_v40  ;;  %v576_v7 = vpop.f32.mrb[9].mxu1 }
 0x37d   :  { %v1379_v8 = vmax.f32 %v395_v4, %v396_v3  ;;  %v577_v10 = vadd.f32 %v576_v7, %v137_v40  ;;  %v766_v40 = vld [vmem:[#allocation2 + $0x178] sm:$0xff] }
 0x37e   :  { %v586_v11 = vmul.f32 %v582_v6, %v1381_v9  ;;  %v1190_v41 = vpack.c.bf16 %v766_v40, %v765_v39 }
 0x37f   :  { %v585_v12 = vmul.f32 %v577_v10, %v1375_v62  ;;  %v398_v43 = vrot.slane %v1379_v8, 4 }
 0x381   :  { %v1132_v13 = vpack.c.bf16 %v586_v11, %v585_v12  ;;  %v399_v47 = vmax.f32 %v1379_v8, %v398_v43 }
 0x383   :  { %1133 = vmatprep.subr.bf16.mxu1 %v1132_v13  ;;  %v400_v51 = vrot.slane %v399_v47, 2 }
 0x384   :  { %1135 = vmatpush3.bf16.msra.mxu1 %v1132_v13 }
 0x385   :  { %1137 = vmatprep.subr.bf16.mxu1 %v1304_v14  ;;  %v401_v54 = vmax.f32 %v399_v47, %v400_v51 }
 0x387   :  { %1016 = vmatmul.mubr.msk.f32.vlgmr.msra.gmra.mrb[10].mxu1 %vm50_vm0, %v857_v53  ;;  %v402_v57 = vrot.slane %v401_v54, 1 }
 0x388   :  { %1139 = vmatpush3.bf16.msra.mxu1 %v1304_v14  ;;  %v751_v14 = vld [vmem:[#allocation2 + $0x100] sm:$0xff] }
 0x389   :  { %1141 = vmatprep.subr.bf16.mxu1 %v1306_v16  ;;  %v1169_v18 = vpack.c.bf16 %v752_v15, %v751_v14  ;;  %v403_v60 = vmax.f32 %v401_v54, %v402_v57 }
 0x38b   :  { %1170 = vmatpush3.bf16.msra.mxu0 %v1169_v18 }
 0x38c   :  { %1143 = vmatpush3.bf16.msra.mxu1 %v1306_v16  ;;  %v753_v16 = vld [vmem:[#allocation2 + $0x110] sm:$0xff]  ;;  %1171 = vmatprep.subr.bf16.mxu0 %v1229_v17 }
 0x38d   :  { %1145 = vmatprep.subr.bf16.mxu1 %v1311_v19 }
 0x390   :  { %1147 = vmatpush3.bf16.msra.mxu1 %v1311_v19  ;;  %v754_v19 = vld [vmem:[#allocation2 + $0x118] sm:$0xff] }
 0x391   :  { %1149 = vmatprep.subr.bf16.mxu1 %v1315_v22  ;;  %v1172_v20 = vpack.c.bf16 %v754_v19, %v753_v16 }
 0x393   :  { %1173 = vmatpush3.bf16.msra.mxu0 %v1172_v20 }
 0x394   :  { %1151 = vmatpush3.bf16.msra.mxu1 %v1315_v22  ;;  %v756_v22 = vld [vmem:[#allocation2 + $0x128] sm:$0xff]  ;;  %1174 = vmatprep.subr.bf16.mxu0 %v1229_v17 }
 0x395   :  { %1153 = vmatprep.subr.bf16.mxu1 %v1319_v25  ;;  %v1175_v23 = vpack.c.bf16 %v756_v22, %v755_v21 }
 0x397   :  { %1176 = vmatpush3.bf16.msra.mxu0 %v1175_v23 }
 0x398   :  { %1155 = vmatpush3.bf16.msra.mxu1 %v1319_v25  ;;  %1177 = vmatprep.subr.bf16.mxu0 %v1229_v17 }
 0x399   :  { %1157 = vmatprep.subr.bf16.mxu1 %v1323_v28 }
 0x39c   :  { %1159 = vmatpush3.bf16.msra.mxu1 %v1323_v28  ;;  %v1178_v28 = vpack.c.bf16 %v758_v27, %v757_v26 }
 0x39d   :  { %1161 = vmatprep.subr.bf16.mxu1 %v1327_v31 }
 0x39e   :  { %1179 = vmatpush3.bf16.msra.mxu0 %v1178_v28 }
 0x39f   :  { %1180 = vmatprep.subr.bf16.mxu0 %v1229_v17 }
 0x3a0   :  { %1163 = vmatpush3.bf16.msra.mxu1 %v1327_v31  ;;  %v1181_v31 = vpack.c.bf16 %v760_v30, %v759_v29 }
 0x3a1   :  { %1165 = vmatprep.subr.bf16.mxu1 %v1331_v34 }
 0x3a2   :  { %1182 = vmatpush3.bf16.msra.mxu0 %v1181_v31 }
 0x3a3   :  { %1183 = vmatprep.subr.bf16.mxu0 %v1229_v17 }
 0x3a4   :  { %1167 = vmatpush3.bf16.msra.mxu1 %v1331_v34  ;;  %v1184_v34 = vpack.c.bf16 %v762_v33, %v761_v32 }
 0x3a6   :  { %1185 = vmatpush3.bf16.msra.mxu0 %v1184_v34 }
 0x3a7   :  { %1186 = vmatprep.subr.bf16.mxu0 %v1229_v17 }
 0x3aa   :  { %1188 = vmatpush3.bf16.msra.mxu0 %v1187_v38 }
 0x3ab   :  { %1189 = vmatprep.subr.bf16.mxu0 %v1229_v17 }
 0x3ae   :  { %1191 = vmatpush3.bf16.msra.mxu0 %v1190_v41 }
 0x45a   :  { %v1017_v24 = vpop.f32.mrb[10].mxu1 }
 0x45b   :  { %v653_v25 = vpop.f32.mrb[11].mxu1 }
 0x45c   :  { %1050 = vmatprep.mubr.f32.mxu1 %v653_v25 }
 0x45d   :  { %1051 = vmatmul.mubr.f32.vlgmr.msra.gmra.mrb[12].mxu1 %v1017_v24 }
 0x530   :  { %v1052_v44 = vpop.f32.mrb[12].mxu1 }
 0x531   :  { %v734_v45 = vadd.f32 %v1052_v44, %v1373_v61  ;;  %v728_v46 = vpop.f32.mrb[13].mxu1 }
 0x532   :  { %v729_v48 = vadd.f32 %v728_v46, %v1373_v61  ;;  %v868_v61 = vld [vmem:[%s1419_s4 + $0x10] sm:$0xff] }
 0x533   :  { %v738_v49 = vmul.f32 %v734_v45, %v1381_v9 }
 0x534   :  { %v737_v50 = vmul.f32 %v729_v48, %v1375_v62  ;;  %v772_v62 = vrot.slane %v868_v61, %v1336_v37 }
 0x536   :  { %v739_v52 = vmax.f32 %v737_v50, %v738_v49 }
 0x538   :  { %v740_v53 = vrot.slane %v739_v52, 4 }
 0x53a   :  { %v741_v55 = vmax.f32 %v739_v52, %v740_v53 }
 0x53c   :  { %v742_v56 = vrot.slane %v741_v55, 2 }
 0x53e   :  { %v743_v58 = vmax.f32 %v741_v55, %v742_v56 }
 0x540   :  { %v744_v59 = vrot.slane %v743_v58, 1 }
 0x542   :  { %v745_v63 = vmax.f32 %v743_v58, %v744_v59 }
 0x544   :  { %v747_v0 = vsel %vm746_vm3, %v403_v60, %v745_v63 }
 0x545   :  { %1086 = vmatmul.mubr.msk.f32.vlgmr.msra.gmra.mrb[2].mxu0 %vm748_vm4, %v747_v0 }
 0x618   :  { %v839_v1 = vpop.f32.mrb[2].mxu0 }
 0x619   :  { %v840_v2 = vadd.f32 %v839_v1, %v772_v62  ;;  %v1087_v3 = vpop.f32.mrb[3].mxu0 }
 0x61b   :  { %843 = vst [vmem:[%s1420_s5] sm:$0xff] %v840_v2 }
 0x61c   :  { %848 = vsyncpa [#allocation3], 1 }

</bundles_post_ra>
